<compile_context>
chip_gen: v6e
topology: v6e:2x2x1
jax: 0.10.0
libtpu: 0.0.40
codegen_flags: <defaults>
</compile_context>

<pallas_src>
import jax
import jax.numpy as jnp
import numpy as np
from jax.experimental import pallas as pl
from jax.experimental.pallas import tpu as pltpu

_LANE = 128
_MiB = 1024 * 1024


# --------------------------------------------------------------------------
# Pallas kernel: transpose one (bb, tn, tc) tile into a (bb, tc, tn) tile
# --------------------------------------------------------------------------
def _transpose_tile_kernel(x_ref, o_ref):
    # x_ref: (bb, tn, tc) tile of the (B, N, C) input
    # o_ref: (bb, tc, tn) tile of the (B, C, N) output
    o_ref[...] = jnp.transpose(x_ref[...], (0, 2, 1))


# --------------------------------------------------------------------------
# Helpers
# --------------------------------------------------------------------------
def _round_up(x, m):
    return ((x + m - 1) // m) * m


def _vmem_capacity_bytes():
    """Per-core VMEM capacity; conservative fallback = v7x (64 MiB/TC)."""
    try:
        cap = int(pltpu.get_tpu_info().vmem_capacity_bytes)
        if cap > 0:
            return cap
    except Exception:
        pass
    return 64 * _MiB


def _pick_tile(dim, max_tile_elems):
    """Largest multiple of 128 dividing `dim` (itself a 128-multiple), <= cap."""
    max_tile_elems = max(_LANE, (max_tile_elems // _LANE) * _LANE)
    best = _LANE
    t = 2 * _LANE
    while t <= min(dim, max_tile_elems):
        if dim % t == 0:
            best = t
        t += _LANE
    return best


# --------------------------------------------------------------------------
# Forward pass
# --------------------------------------------------------------------------
def patch_to_3d(x, patch_num):
    """x: (B, N, C) with N == patch_num == p**3  ->  (B, C, p, p, p)."""
    p = int(round(patch_num ** (1.0 / 3.0)))
    assert p ** 3 == patch_num, "patch_num should be a perfect cube."
    B, N, C = x.shape
    assert N == patch_num, "sequence length must equal patch_num."

    itemsize = jnp.dtype(x.dtype).itemsize

    # Pad N, C to multiples of 128 so loads and transposed stores are
    # lane-dense on every p / channel count; sliced off after the kernel.
    Np = _round_up(N, _LANE)
    Cp = _round_up(C, _LANE)
    if (Np, Cp) != (N, C):
        x = jnp.pad(x, ((0, 0), (0, Np - N), (0, Cp - C)))

    # ---- generation-aware byte budgets (byte-based, dtype-agnostic) -----
    vmem_cap = _vmem_capacity_bytes()
    max_block_bytes = max(vmem_cap // 8, 2 * _MiB)   # per input block
    target_block_bytes = 2 * _MiB                    # => ~4 MiB moved / step

    # ---- tile selection: 128-multiples dividing the padded dims ---------
    tc = _pick_tile(Cp, max_block_bytes // (_LANE * itemsize))
    tn = _pick_tile(Np, max_block_bytes // (tc * itemsize))

    # Batch sub-block: grow bytes/step toward the target when the per-batch
    # (N, C) slab alone is small.
    bb = 1
    base_bytes = tn * tc * itemsize
    if base_bytes < target_block_bytes:
        for d in range(1, B + 1):
            if B % d != 0:
                continue
            if d * base_bytes > max_block_bytes:
                break
            bb = d
            if d * base_bytes >= target_block_bytes:
                break

    # Megacore: guarantee >= 2 parallel grid steps so v7x's second
    # TensorCore (and its HBM bandwidth) participates.
    if (B // bb) * (Np // tn) * (Cp // tc) == 1:
        if tn >= 2 * _LANE:
            tn //= 2
        elif tc >= 2 * _LANE:
            tc //= 2
        elif bb > 1:
            bb = max(d for d in range(1, bb) if B % d == 0)
    grid = (B // bb, Np // tn, Cp // tc)

    # VMEM: 2 pipeline buffers for the input block + 2 for the output block,
    # plus headroom; never the full physical capacity of a core.
    block_bytes = bb * tn * tc * itemsize
    vmem_need = 2 * 2 * block_bytes
    vmem_limit = int(min(max(2 * vmem_need, 16 * _MiB), (vmem_cap * 3) // 4))

    out_bcn = pl.pallas_call(
        _transpose_tile_kernel,
        grid=grid,
        in_specs=[pl.BlockSpec((bb, tn, tc), lambda b, i, j: (b, i, j))],
        out_specs=pl.BlockSpec((bb, tc, tn), lambda b, i, j: (b, j, i)),
        out_shape=jax.ShapeDtypeStruct((B, Cp, Np), x.dtype),
        compiler_params=pltpu.CompilerParams(
            # pure element shuffle; every grid point writes a distinct block
            dimension_semantics=("parallel", "parallel", "parallel"),
            vmem_limit_bytes=vmem_limit,
        ),
        cost_estimate=pl.CostEstimate(
            flops=0,
            transcendentals=0,
            bytes_accessed=2 * B * Np * Cp * itemsize,
        ),
    )(x)

    # Un-pad, then reshape (B, C, N) -> (B, C, p, p, p) (metadata only).
    if (Np, Cp) != (N, C):
        out_bcn = out_bcn[:, :C, :N]
    return out_bcn.reshape(B, C, p, p, p)


# --------------------------------------------------------------------------
if __name__ == "__main__":
    key = jax.random.PRNGKey(0)

    # Case 1: lane-aligned shapes (p=8 -> N=512, C=256), f32.
    B, p, C = 2, 8, 256
    patch_num = p ** 3
    x = jax.random.normal(key, (B, patch_num, C), jnp.float32)
    out = jax.block_until_ready(jax.jit(lambda t: patch_to_3d(t, patch_num))(x))
    ref = jnp.transpose(x, (0, 2, 1)).reshape(B, C, p, p, p)
    assert out.shape == (B, C, p, p, p)
    np.testing.assert_array_equal(np.asarray(out), np.asarray(ref))

    # Case 2: non-128-multiple N and C (p=4 -> N=64, C=96), bf16 — exercises
    # the lane-dense padding path and the byte-budget tiling for 16-bit data.
    key2 = jax.random.fold_in(key, 1)
    B2, p2, C2 = 3, 4, 96
    patch_num2 = p2 ** 3
    x2 = jax.random.normal(key2, (B2, patch_num2, C2), jnp.bfloat16)
    out2 = jax.block_until_ready(jax.jit(lambda t: patch_to_3d(t, patch_num2))(x2))
    ref2 = jnp.transpose(x2, (0, 2, 1)).reshape(B2, C2, p2, p2, p2)
    assert out2.shape == (B2, C2, p2, p2, p2)
    np.testing.assert_array_equal(
        np.asarray(out2.astype(jnp.float32)), np.asarray(ref2.astype(jnp.float32)))

    print("KERNEL_OK")
</pallas_src>

<mosaic_0001>
module attributes {stable_mosaic.version = 11 : i64} {
  func.func @_transpose_tile_kernel(%arg0: i32, %arg1: i32, %arg2: i32, %arg3: memref<2x256x256xf32, #tpu.memory_space<vmem>>, %arg4: memref<2x256x256xf32, #tpu.memory_space<vmem>>) attributes {dimension_semantics = [#tpu.dimension_semantics<parallel>, #tpu.dimension_semantics<parallel>, #tpu.dimension_semantics<parallel>], iteration_bounds = array<i64: 1, 2, 1>, scalar_prefetch = 0 : i64, scratch_operands = 0 : i64, tpu.core_type = #tpu.core_type<tc>, window_params = [{transform_indices = @transform_0, window_bounds = array<i64: 2, 256, 256>}, {transform_indices = @transform_1, window_bounds = array<i64: 2, 256, 256>}]} {
    %c0 = arith.constant 0 : index
    %c0_0 = arith.constant 0 : index
    %c0_1 = arith.constant 0 : index
    %0 = vector.load %arg3[%c0, %c0_0, %c0_1] : memref<2x256x256xf32, #tpu.memory_space<vmem>>, vector<2x256x256xf32>
    %1 = tpu.transpose %0, [0, 2, 1] : vector<2x256x256xf32> -> vector<2x256x256xf32>
    %c0_2 = arith.constant 0 : index
    %c0_3 = arith.constant 0 : index
    %c0_4 = arith.constant 0 : index
    %2 = vector.load %arg4[%c0_2, %c0_3, %c0_4] : memref<2x256x256xf32, #tpu.memory_space<vmem>>, vector<2x256x256xf32>
    tpu.vector_store %arg4[%c0_2, %c0_3, %c0_4], %1 {strides = array<i32>} : memref<2x256x256xf32, #tpu.memory_space<vmem>>, vector<2x256x256xf32>,
    return
  }
  func.func @transform_0(%arg0: i32, %arg1: i32, %arg2: i32) -> (i32, i32, i32) {
    %c0_i32 = arith.constant 0 : i32
    return %arg0, %arg1, %arg2 : i32, i32, i32
  }
  func.func @transform_1(%arg0: i32, %arg1: i32, %arg2: i32) -> (i32, i32, i32) {
    %c0_i32 = arith.constant 0 : i32
    return %arg0, %arg2, %arg1 : i32, i32, i32
  }
}

</mosaic_0001>

<bundles_post_ra>
// kernel: _lambda_.1
= control target key start
LH: loop header
LB: loop body
LE: loop exit
PB: predicated region body
PF: predicated region fallthrough
CT: control target
= control target key end

     0   :  { %6 = vsyncpa [#allocation3], 0  ;;  %s1858_s0 = inlined_call_operand.hbm [shape: f32[2,512,256], index: 0, kind: input, shape index: {}]   ;;  %s1859_s1 = inlined_call_operand.vmem [shape: f32[2,256,512], index: 1, kind: output, shape index: {}]  }
   0x1   :  { %8 = vsyncpa [#allocation3 + $0x1], 0  ;;  %s1229_s6 = smov 0   ;;  %s1231_s7 = smov 0  }
   0x2   :  { %s1233_s8 = smov 0   ;;  %s1235_s9 = smov 0  }
   0x3   :  { %s1237_s10 = smov 0   ;;  %s1239_s11 = smov 0  }
   0x4 LB: > { %s1077_s12 = sadd.s32 4294967295, %s1211_s11   ;;  %s29_s13 = sadd.s32 1, %s1207_s10  ;;  %s1211_s11 = sphi %s1239_s11, %s14_s11   ;;  %s1207_s10 = sphi %s1237_s10, %s1867_s10   ;;  %s1203_s9 = sphi %s1235_s9, %s1866_s9   ;;  %s1199_s8 = sphi %s1233_s8, %s1865_s8   ;;  %s1195_s7 = sphi %s1231_s7, %s1864_s7   ;;  %s1191_s6 = sphi %s1229_s6, %s1863_s6  }
   0x5   : > { %p31_p0 = scmp.ge.s32.totalorder %s29_s13, 2  ;;  %s44_s14 = sadd.s32 1, %s1199_s8 }
   0x6   : > { %p51_p1 = scmp.ne.s32.totalorder %s1199_s8, %s1195_s7  ;;  %p52_p2 = scmp.eq.s32.totalorder %s1211_s11, 0 }
   0x7   : > { %s1869_s13 = smov (%p31_p0, %s29_s13), 0  ;;  %p57_p4 = scmp.ne.s32.totalorder %s1195_s7, %s1191_s6 }
   0x8   : > { %p1265_p3 = por %p52_p2, %p51_p1  ;;  %s38_s16 = ssub.s32 %s1207_s10, %s1869_s13 }
   0x9   : > { %p58_p5 = scmp.eq.s32.totalorder %s1077_s12, 0  ;;  %p42_p6 = scmp.eq.s32.totalorder %s38_s16, 0 }
   0xa   : > { %p85_p7 = scmp.eq.s32.totalorder %s1077_s12, 1  ;;  %p1080_p10 = scmp.ge.s32.totalorder %s1211_s11, 2 }
   0xb   : > { %p1272_p8 = por %p58_p5, %p57_p4 }
   0xc   : > { %s1277_s18 = scalar_select %p42_p6, %s1199_s8, %s44_s14  }
   0xd   : > { %p1279_p9 = por %p85_p7, %p51_p1  ;;  %107 = sbr.rel (%p1080_p10) target bundleno = 31 (0x1f), region = 16 }
  0x12   : > { %s111_s20 = sand.u32 1, %s1199_s8   ;;  %s1096_s21 = sshll.u32 %s1207_s10, 13 }
  0x13   : > { %s1081_s22 = sshll.u32 %s111_s20, 10  ;;  %s127_s25 = scalar_lea.hbm %s1858_s0, %s1096_s21 }
  0x14   : > { %s1098_s26 = scalar_select %p1265_p3, [#allocation0], [#allocation7] }
  0x15   : > { %s115_s27 = scalar_lea.vmem [#allocation2], %s1081_s22  ;;  %s1213_s30 = smov 16384  }
  0x16   : > { %s140_s28 = sshll.u32 %s115_s27, 4  ;;  %s132_s29 = sld [smem:[%s1098_s26]]   ;;  %s141_s28 = int_to_ptr.vmem [resolvable:$true] %s140_s28 }
  0x17   : > { %1099 = sst [smem:[#allocation6]] (%p1265_p3), %s1213_s30  ;;  %s1214_s2 = smov 8192  }
  0x18   : > { %1100 = sst [smem:[#allocation6 + $0x1]] (%p1265_p3), %s1214_s2  ;;  %s1215_s3 = smov 32  }
  0x19   : > { %1101 = sst [smem:[#allocation6 + $0x2]] (%p1265_p3), %s1215_s3  ;;  %s1216_s4 = smov 256  }
  0x1a   : > { %1102 = sst [smem:[#allocation6 + $0x3]] (%p1265_p3), %s1216_s4  ;;  %s1217_s6 = smov 16  }
  0x1b   : > { %1103 = sst [smem:[#allocation6 + $0x4]] (%p1265_p3), %s1216_s4  ;;  %s112_s14 = scalar_lea.sflag [#allocation3], %s111_s20 }
  0x1c   : > { %s1085_s5 = sshll.u32 %s132_s29, 26  ;;  %1104 = sst [smem:[#allocation6 + $0x5]] (%p1265_p3), %s1217_s6 }
  0x1d   : > { %s1086_s12 = sadd.s32 134217728, %s1085_s5  ;;  %s1218_s16 = smov 131072  }
  0x1e   : > { %1105 = dma.general (%p1265_p3), %s127_s25, 16384, %s141_s28, %s112_s14, %s1218_s16, [#allocation6], %s1086_s12, 0  }
  0x1f PF: > { %p1087_p11 = scmp.ge.s32.totalorder %s1211_s11, 1  ;;  %p161_p12 = scmp.lt.s32.totalorder %s1211_s11, 3 }
  0x21   : > { %p162_p13 = pnand %p1087_p11, %p161_p12 }
  0x22   : > { %s167_s21 = sand.u32 (!%p162_p13), 1, %s1195_s7  }
  0x23   : > { %165 = sbr.rel (%p162_p13) target bundleno = 429 (0x1ad), region = 24  ;;  %s1308_s22 = sshll.u32 (!%p162_p13), %s167_s21, 10 }
  0x24   : > { %s168_s23 = scalar_lea.sflag (!%p162_p13), [#allocation3], %s167_s21  ;;  %s1311_s24 = scalar_lea.vmem (!%p162_p13), [#allocation2], %s1308_s22 }
  0x28   : > { %1186 = dma.done.wait (%p1272_p8), %s168_s23, 16384  }
  0x29   : > { %1188 = vsyncadd (%p1272_p8), %s168_s23, 4294950912  ;;  %v196_v0 = vld [vmem:[%s1311_s24 + $0x8] sm:$0xff]  ;;  %v195_v1 = vld [vmem:[%s1311_s24] sm:$0xff]  ;;  %s1382_s15 = scalar_lea.vmem [#allocation4], %s1308_s22  ;;  %s1097_s17 = sshll.u32 (%p1279_p9), %s1203_s9, 4 }
  0x2a   : > { %355 = vxpose.xlu1.b32.start [1/16] %v196_v0, 128  ;;  %323 = vxpose.xlu0.b32.start [1/16] %v195_v1, 128  ;;  %v198_v2 = vld [vmem:[%s1311_s24 + $0x18] sm:$0xff]  ;;  %v197_v3 = vld [vmem:[%s1311_s24 + $0x10] sm:$0xff]  ;;  %v200_v4 = vld [vmem:[%s1311_s24 + $0x28] sm:$0xff]  ;;  %s1585_s26 = scalar_lea.vmem (%p1279_p9), %s1859_s1, %s1097_s17 }
  0x2b   : > { %v199_v5 = vld [vmem:[%s1311_s24 + $0x20] sm:$0xff]  ;;  %v202_v6 = vld [vmem:[%s1311_s24 + $0x38] sm:$0xff]  ;;  %v201_v7 = vld [vmem:[%s1311_s24 + $0x30] sm:$0xff] }
  0x2c   : > { %v204_v8 = vld [vmem:[%s1311_s24 + $0x48] sm:$0xff]  ;;  %v203_v9 = vld [vmem:[%s1311_s24 + $0x40] sm:$0xff]  ;;  %v206_v10 = vld [vmem:[%s1311_s24 + $0x58] sm:$0xff] }
  0x2d   : > { %v205_v11 = vld [vmem:[%s1311_s24 + $0x50] sm:$0xff]  ;;  %v208_v12 = vld [vmem:[%s1311_s24 + $0x68] sm:$0xff]  ;;  %v207_v13 = vld [vmem:[%s1311_s24 + $0x60] sm:$0xff] }
  0x2e   : > { %356 = vxpose.xlu1.b32.cont [2/16] %v198_v2, 128  ;;  %324 = vxpose.xlu0.b32.cont [2/16] %v197_v3, 128  ;;  %v210_v14 = vld [vmem:[%s1311_s24 + $0x78] sm:$0xff]  ;;  %v209_v15 = vld [vmem:[%s1311_s24 + $0x70] sm:$0xff]  ;;  %v212_v16 = vld [vmem:[%s1311_s24 + $0x88] sm:$0xff] }
  0x2f   : > { %v211_v17 = vld [vmem:[%s1311_s24 + $0x80] sm:$0xff]  ;;  %v214_v18 = vld [vmem:[%s1311_s24 + $0x98] sm:$0xff]  ;;  %v213_v19 = vld [vmem:[%s1311_s24 + $0x90] sm:$0xff] }
  0x30   : > { %v216_v20 = vld [vmem:[%s1311_s24 + $0xa8] sm:$0xff]  ;;  %v215_v21 = vld [vmem:[%s1311_s24 + $0xa0] sm:$0xff]  ;;  %v218_v22 = vld [vmem:[%s1311_s24 + $0xb8] sm:$0xff] }
  0x31   : > { %v217_v23 = vld [vmem:[%s1311_s24 + $0xb0] sm:$0xff]  ;;  %v220_v24 = vld [vmem:[%s1311_s24 + $0xc8] sm:$0xff]  ;;  %v219_v25 = vld [vmem:[%s1311_s24 + $0xc0] sm:$0xff] }
  0x32   : > { %357 = vxpose.xlu1.b32.cont [3/16] %v200_v4, 128  ;;  %325 = vxpose.xlu0.b32.cont [3/16] %v199_v5, 128  ;;  %v222_v26 = vld [vmem:[%s1311_s24 + $0xd8] sm:$0xff]  ;;  %v221_v27 = vld [vmem:[%s1311_s24 + $0xd0] sm:$0xff]  ;;  %v224_v28 = vld [vmem:[%s1311_s24 + $0xe8] sm:$0xff] }
  0x33   : > { %v223_v29 = vld [vmem:[%s1311_s24 + $0xe0] sm:$0xff]  ;;  %v226_v30 = vld [vmem:[%s1311_s24 + $0xf8] sm:$0xff]  ;;  %v225_v31 = vld [vmem:[%s1311_s24 + $0xf0] sm:$0xff] }
  0x34   : > { %v228_v32 = vld [vmem:[%s1311_s24 + $0x108] sm:$0xff]  ;;  %v227_v33 = vld [vmem:[%s1311_s24 + $0x100] sm:$0xff]  ;;  %v230_v34 = vld [vmem:[%s1311_s24 + $0x118] sm:$0xff] }
  0x35   : > { %v229_v35 = vld [vmem:[%s1311_s24 + $0x110] sm:$0xff]  ;;  %v232_v36 = vld [vmem:[%s1311_s24 + $0x128] sm:$0xff]  ;;  %v231_v37 = vld [vmem:[%s1311_s24 + $0x120] sm:$0xff] }
  0x36   : > { %358 = vxpose.xlu1.b32.cont [4/16] %v202_v6, 128  ;;  %326 = vxpose.xlu0.b32.cont [4/16] %v201_v7, 128  ;;  %v234_v38 = vld [vmem:[%s1311_s24 + $0x138] sm:$0xff]  ;;  %v233_v39 = vld [vmem:[%s1311_s24 + $0x130] sm:$0xff]  ;;  %v236_v40 = vld [vmem:[%s1311_s24 + $0x148] sm:$0xff] }
  0x37   : > { %v235_v41 = vld [vmem:[%s1311_s24 + $0x140] sm:$0xff]  ;;  %v238_v42 = vld [vmem:[%s1311_s24 + $0x158] sm:$0xff]  ;;  %v237_v43 = vld [vmem:[%s1311_s24 + $0x150] sm:$0xff] }
  0x38   : > { %v240_v44 = vld [vmem:[%s1311_s24 + $0x168] sm:$0xff]  ;;  %v239_v45 = vld [vmem:[%s1311_s24 + $0x160] sm:$0xff]  ;;  %v242_v46 = vld [vmem:[%s1311_s24 + $0x178] sm:$0xff] }
  0x39   : > { %v241_v47 = vld [vmem:[%s1311_s24 + $0x170] sm:$0xff]  ;;  %v244_v48 = vld [vmem:[%s1311_s24 + $0x188] sm:$0xff]  ;;  %v243_v49 = vld [vmem:[%s1311_s24 + $0x180] sm:$0xff] }
  0x3a   : > { %359 = vxpose.xlu1.b32.cont [5/16] %v204_v8, 128  ;;  %327 = vxpose.xlu0.b32.cont [5/16] %v203_v9, 128  ;;  %v246_v50 = vld [vmem:[%s1311_s24 + $0x198] sm:$0xff]  ;;  %v245_v51 = vld [vmem:[%s1311_s24 + $0x190] sm:$0xff]  ;;  %v248_v52 = vld [vmem:[%s1311_s24 + $0x1a8] sm:$0xff] }
  0x3b   : > { %v247_v53 = vld [vmem:[%s1311_s24 + $0x1a0] sm:$0xff]  ;;  %v250_v54 = vld [vmem:[%s1311_s24 + $0x1b8] sm:$0xff]  ;;  %v249_v55 = vld [vmem:[%s1311_s24 + $0x1b0] sm:$0xff] }
  0x3c   : > { %v252_v56 = vld [vmem:[%s1311_s24 + $0x1c8] sm:$0xff]  ;;  %v251_v57 = vld [vmem:[%s1311_s24 + $0x1c0] sm:$0xff]  ;;  %v254_v58 = vld [vmem:[%s1311_s24 + $0x1d8] sm:$0xff] }
  0x3d   : > { %v253_v59 = vld [vmem:[%s1311_s24 + $0x1d0] sm:$0xff]  ;;  %v256_v60 = vld [vmem:[%s1311_s24 + $0x1e8] sm:$0xff]  ;;  %v255_v61 = vld [vmem:[%s1311_s24 + $0x1e0] sm:$0xff] }
  0x3e   : > { %360 = vxpose.xlu1.b32.cont [6/16] %v206_v10, 128  ;;  %328 = vxpose.xlu0.b32.cont [6/16] %v205_v11, 128  ;;  %v258_v62 = vld [vmem:[%s1311_s24 + $0x1f8] sm:$0xff]  ;;  %v257_v63 = vld [vmem:[%s1311_s24 + $0x1f0] sm:$0xff]  ;;  %v260_v2 = vld [vmem:[%s1311_s24 + $0x208] sm:$0xff] }
  0x3f   : > { %v259_v3 = vld [vmem:[%s1311_s24 + $0x200] sm:$0xff]  ;;  %v262_v6 = vld [vmem:[%s1311_s24 + $0x218] sm:$0xff]  ;;  %v261_v7 = vld [vmem:[%s1311_s24 + $0x210] sm:$0xff] }
  0x40   : > { %v264_v10 = vld [vmem:[%s1311_s24 + $0x228] sm:$0xff]  ;;  %v263_v11 = vld [vmem:[%s1311_s24 + $0x220] sm:$0xff] }
  0x42   : > { %361 = vxpose.xlu1.b32.cont [7/16] %v208_v12, 128  ;;  %329 = vxpose.xlu0.b32.cont [7/16] %v207_v13, 128 }
  0x46   : > { %362 = vxpose.xlu1.b32.cont [8/16] %v210_v14, 128  ;;  %330 = vxpose.xlu0.b32.cont [8/16] %v209_v15, 128  ;;  %v266_v14 = vld [vmem:[%s1311_s24 + $0x238] sm:$0xff]  ;;  %v265_v15 = vld [vmem:[%s1311_s24 + $0x230] sm:$0xff] }
  0x4a   : > { %363 = vxpose.xlu1.b32.cont [9/16] %v212_v16, 128  ;;  %331 = vxpose.xlu0.b32.cont [9/16] %v211_v17, 128 }
  0x4e   : > { %364 = vxpose.xlu1.b32.cont [10/16] %v214_v18, 128  ;;  %332 = vxpose.xlu0.b32.cont [10/16] %v213_v19, 128  ;;  %v268_v18 = vld [vmem:[%s1311_s24 + $0x248] sm:$0xff]  ;;  %v267_v19 = vld [vmem:[%s1311_s24 + $0x240] sm:$0xff] }
  0x52   : > { %365 = vxpose.xlu1.b32.cont [11/16] %v216_v20, 128  ;;  %333 = vxpose.xlu0.b32.cont [11/16] %v215_v21, 128 }
  0x56   : > { %366 = vxpose.xlu1.b32.cont [12/16] %v218_v22, 128  ;;  %334 = vxpose.xlu0.b32.cont [12/16] %v217_v23, 128  ;;  %v270_v22 = vld [vmem:[%s1311_s24 + $0x258] sm:$0xff]  ;;  %v269_v23 = vld [vmem:[%s1311_s24 + $0x250] sm:$0xff] }
  0x5a   : > { %367 = vxpose.xlu1.b32.cont [13/16] %v220_v24, 128  ;;  %335 = vxpose.xlu0.b32.cont [13/16] %v219_v25, 128 }
  0x5e   : > { %368 = vxpose.xlu1.b32.cont [14/16] %v222_v26, 128  ;;  %336 = vxpose.xlu0.b32.cont [14/16] %v221_v27, 128  ;;  %v272_v26 = vld [vmem:[%s1311_s24 + $0x268] sm:$0xff]  ;;  %v271_v27 = vld [vmem:[%s1311_s24 + $0x260] sm:$0xff] }
  0x62   : > { %369 = vxpose.xlu1.b32.cont [15/16] %v224_v28, 128  ;;  %337 = vxpose.xlu0.b32.cont [15/16] %v223_v29, 128 }
  0x66   : > { %370 = vxpose.xlu1.b32.end [16/16] %v226_v30, 128  ;;  %338 = vxpose.xlu0.b32.end [16/16] %v225_v31, 128  ;;  %v274_v30 = vld [vmem:[%s1311_s24 + $0x278] sm:$0xff]  ;;  %v273_v31 = vld [vmem:[%s1311_s24 + $0x270] sm:$0xff] }
  0x6a   : > { %419 = vxpose.xlu1.b32.start [1/16] %v228_v32, 128  ;;  %387 = vxpose.xlu0.b32.start [1/16] %v227_v33, 128 }
  0x6e   : > { %420 = vxpose.xlu1.b32.cont [2/16] %v230_v34, 128  ;;  %388 = vxpose.xlu0.b32.cont [2/16] %v229_v35, 128  ;;  %v276_v34 = vld [vmem:[%s1311_s24 + $0x288] sm:$0xff]  ;;  %v275_v35 = vld [vmem:[%s1311_s24 + $0x280] sm:$0xff] }
  0x72   : > { %421 = vxpose.xlu1.b32.cont [3/16] %v232_v36, 128  ;;  %389 = vxpose.xlu0.b32.cont [3/16] %v231_v37, 128 }
  0x76   : > { %422 = vxpose.xlu1.b32.cont [4/16] %v234_v38, 128  ;;  %390 = vxpose.xlu0.b32.cont [4/16] %v233_v39, 128  ;;  %v278_v38 = vld [vmem:[%s1311_s24 + $0x298] sm:$0xff]  ;;  %v277_v39 = vld [vmem:[%s1311_s24 + $0x290] sm:$0xff] }
  0x7a   : > { %423 = vxpose.xlu1.b32.cont [5/16] %v236_v40, 128  ;;  %391 = vxpose.xlu0.b32.cont [5/16] %v235_v41, 128 }
  0x7e   : > { %424 = vxpose.xlu1.b32.cont [6/16] %v238_v42, 128  ;;  %392 = vxpose.xlu0.b32.cont [6/16] %v237_v43, 128  ;;  %v280_v42 = vld [vmem:[%s1311_s24 + $0x2a8] sm:$0xff]  ;;  %v279_v43 = vld [vmem:[%s1311_s24 + $0x2a0] sm:$0xff] }
  0x82   : > { %425 = vxpose.xlu1.b32.cont [7/16] %v240_v44, 128  ;;  %393 = vxpose.xlu0.b32.cont [7/16] %v239_v45, 128 }
  0x86   : > { %426 = vxpose.xlu1.b32.cont [8/16] %v242_v46, 128  ;;  %394 = vxpose.xlu0.b32.cont [8/16] %v241_v47, 128  ;;  %v282_v46 = vld [vmem:[%s1311_s24 + $0x2b8] sm:$0xff]  ;;  %v281_v47 = vld [vmem:[%s1311_s24 + $0x2b0] sm:$0xff] }
  0x8a   : > { %427 = vxpose.xlu1.b32.cont [9/16] %v244_v48, 128  ;;  %395 = vxpose.xlu0.b32.cont [9/16] %v243_v49, 128 }
  0x8e   : > { %428 = vxpose.xlu1.b32.cont [10/16] %v246_v50, 128  ;;  %396 = vxpose.xlu0.b32.cont [10/16] %v245_v51, 128  ;;  %v284_v50 = vld [vmem:[%s1311_s24 + $0x2c8] sm:$0xff]  ;;  %v283_v51 = vld [vmem:[%s1311_s24 + $0x2c0] sm:$0xff] }
  0x92   : > { %429 = vxpose.xlu1.b32.cont [11/16] %v248_v52, 128  ;;  %397 = vxpose.xlu0.b32.cont [11/16] %v247_v53, 128 }
  0x96   : > { %430 = vxpose.xlu1.b32.cont [12/16] %v250_v54, 128  ;;  %398 = vxpose.xlu0.b32.cont [12/16] %v249_v55, 128  ;;  %v286_v54 = vld [vmem:[%s1311_s24 + $0x2d8] sm:$0xff]  ;;  %v285_v55 = vld [vmem:[%s1311_s24 + $0x2d0] sm:$0xff] }
  0x9a   : > { %431 = vxpose.xlu1.b32.cont [13/16] %v252_v56, 128  ;;  %399 = vxpose.xlu0.b32.cont [13/16] %v251_v57, 128 }
  0x9e   : > { %432 = vxpose.xlu1.b32.cont [14/16] %v254_v58, 128  ;;  %400 = vxpose.xlu0.b32.cont [14/16] %v253_v59, 128  ;;  %v288_v58 = vld [vmem:[%s1311_s24 + $0x2e8] sm:$0xff]  ;;  %v287_v59 = vld [vmem:[%s1311_s24 + $0x2e0] sm:$0xff] }
  0xa2   : > { %433 = vxpose.xlu1.b32.cont [15/16] %v256_v60, 128  ;;  %401 = vxpose.xlu0.b32.cont [15/16] %v255_v61, 128 }
  0xa6   : > { %434 = vxpose.xlu1.b32.end [16/16] %v258_v62, 128  ;;  %v371_v0 = vpop.trf.xlu1  ;;  %402 = vxpose.xlu0.b32.end [16/16] %v257_v63, 128  ;;  %v339_v1 = vpop.trf.xlu0  ;;  %v290_v62 = vld [vmem:[%s1311_s24 + $0x2f8] sm:$0xff]  ;;  %v289_v63 = vld [vmem:[%s1311_s24 + $0x2f0] sm:$0xff] }
  0xa7   : > { %611 = vst [vmem:[%s1382_s15 + $0x100] sm:$0xff] %v371_v0  ;;  %579 = vst [vmem:[%s1382_s15] sm:$0xff] %v339_v1 }
  0xaa   : > { %483 = vxpose.xlu1.b32.start [1/16] %v260_v2, 128  ;;  %v372_v4 = vpop.trf.xlu1  ;;  %451 = vxpose.xlu0.b32.start [1/16] %v259_v3, 128  ;;  %v340_v5 = vpop.trf.xlu0  ;;  %v292_v2 = vld [vmem:[%s1311_s24 + $0x308] sm:$0xff]  ;;  %v291_v3 = vld [vmem:[%s1311_s24 + $0x300] sm:$0xff] }
  0xab   : > { %613 = vst [vmem:[%s1382_s15 + $0x110] sm:$0xff] %v372_v4  ;;  %581 = vst [vmem:[%s1382_s15 + $0x10] sm:$0xff] %v340_v5 }
  0xae   : > { %484 = vxpose.xlu1.b32.cont [2/16] %v262_v6, 128  ;;  %v373_v8 = vpop.trf.xlu1  ;;  %452 = vxpose.xlu0.b32.cont [2/16] %v261_v7, 128  ;;  %v341_v9 = vpop.trf.xlu0  ;;  %v294_v6 = vld [vmem:[%s1311_s24 + $0x318] sm:$0xff]  ;;  %v293_v7 = vld [vmem:[%s1311_s24 + $0x310] sm:$0xff] }
  0xaf   : > { %615 = vst [vmem:[%s1382_s15 + $0x120] sm:$0xff] %v373_v8  ;;  %583 = vst [vmem:[%s1382_s15 + $0x20] sm:$0xff] %v341_v9 }
  0xb2   : > { %485 = vxpose.xlu1.b32.cont [3/16] %v264_v10, 128  ;;  %v374_v12 = vpop.trf.xlu1  ;;  %453 = vxpose.xlu0.b32.cont [3/16] %v263_v11, 128  ;;  %v342_v13 = vpop.trf.xlu0  ;;  %v296_v10 = vld [vmem:[%s1311_s24 + $0x328] sm:$0xff]  ;;  %v295_v11 = vld [vmem:[%s1311_s24 + $0x320] sm:$0xff] }
  0xb3   : > { %617 = vst [vmem:[%s1382_s15 + $0x130] sm:$0xff] %v374_v12  ;;  %585 = vst [vmem:[%s1382_s15 + $0x30] sm:$0xff] %v342_v13 }
  0xb6   : > { %486 = vxpose.xlu1.b32.cont [4/16] %v266_v14, 128  ;;  %v375_v16 = vpop.trf.xlu1  ;;  %454 = vxpose.xlu0.b32.cont [4/16] %v265_v15, 128  ;;  %v343_v17 = vpop.trf.xlu0  ;;  %v298_v14 = vld [vmem:[%s1311_s24 + $0x338] sm:$0xff]  ;;  %v297_v15 = vld [vmem:[%s1311_s24 + $0x330] sm:$0xff] }
  0xb7   : > { %619 = vst [vmem:[%s1382_s15 + $0x140] sm:$0xff] %v375_v16  ;;  %587 = vst [vmem:[%s1382_s15 + $0x40] sm:$0xff] %v343_v17 }
  0xba   : > { %487 = vxpose.xlu1.b32.cont [5/16] %v268_v18, 128  ;;  %v376_v20 = vpop.trf.xlu1  ;;  %455 = vxpose.xlu0.b32.cont [5/16] %v267_v19, 128  ;;  %v344_v21 = vpop.trf.xlu0  ;;  %v300_v18 = vld [vmem:[%s1311_s24 + $0x348] sm:$0xff]  ;;  %v299_v19 = vld [vmem:[%s1311_s24 + $0x340] sm:$0xff] }
  0xbb   : > { %621 = vst [vmem:[%s1382_s15 + $0x150] sm:$0xff] %v376_v20  ;;  %589 = vst [vmem:[%s1382_s15 + $0x50] sm:$0xff] %v344_v21 }
  0xbe   : > { %488 = vxpose.xlu1.b32.cont [6/16] %v270_v22, 128  ;;  %v377_v24 = vpop.trf.xlu1  ;;  %456 = vxpose.xlu0.b32.cont [6/16] %v269_v23, 128  ;;  %v345_v25 = vpop.trf.xlu0  ;;  %v302_v22 = vld [vmem:[%s1311_s24 + $0x358] sm:$0xff]  ;;  %v301_v23 = vld [vmem:[%s1311_s24 + $0x350] sm:$0xff] }
  0xbf   : > { %623 = vst [vmem:[%s1382_s15 + $0x160] sm:$0xff] %v377_v24  ;;  %591 = vst [vmem:[%s1382_s15 + $0x60] sm:$0xff] %v345_v25 }
  0xc2   : > { %489 = vxpose.xlu1.b32.cont [7/16] %v272_v26, 128  ;;  %v378_v28 = vpop.trf.xlu1  ;;  %457 = vxpose.xlu0.b32.cont [7/16] %v271_v27, 128  ;;  %v346_v29 = vpop.trf.xlu0  ;;  %v304_v26 = vld [vmem:[%s1311_s24 + $0x368] sm:$0xff]  ;;  %v303_v27 = vld [vmem:[%s1311_s24 + $0x360] sm:$0xff] }
  0xc3   : > { %625 = vst [vmem:[%s1382_s15 + $0x170] sm:$0xff] %v378_v28  ;;  %593 = vst [vmem:[%s1382_s15 + $0x70] sm:$0xff] %v346_v29 }
  0xc6   : > { %490 = vxpose.xlu1.b32.cont [8/16] %v274_v30, 128  ;;  %v379_v32 = vpop.trf.xlu1  ;;  %458 = vxpose.xlu0.b32.cont [8/16] %v273_v31, 128  ;;  %v347_v33 = vpop.trf.xlu0  ;;  %v306_v30 = vld [vmem:[%s1311_s24 + $0x378] sm:$0xff]  ;;  %v305_v31 = vld [vmem:[%s1311_s24 + $0x370] sm:$0xff] }
  0xc7   : > { %627 = vst [vmem:[%s1382_s15 + $0x180] sm:$0xff] %v379_v32  ;;  %595 = vst [vmem:[%s1382_s15 + $0x80] sm:$0xff] %v347_v33 }
  0xca   : > { %491 = vxpose.xlu1.b32.cont [9/16] %v276_v34, 128  ;;  %v380_v36 = vpop.trf.xlu1  ;;  %459 = vxpose.xlu0.b32.cont [9/16] %v275_v35, 128  ;;  %v348_v37 = vpop.trf.xlu0  ;;  %v308_v34 = vld [vmem:[%s1311_s24 + $0x388] sm:$0xff]  ;;  %v307_v35 = vld [vmem:[%s1311_s24 + $0x380] sm:$0xff] }
  0xcb   : > { %629 = vst [vmem:[%s1382_s15 + $0x190] sm:$0xff] %v380_v36  ;;  %597 = vst [vmem:[%s1382_s15 + $0x90] sm:$0xff] %v348_v37 }
  0xce   : > { %492 = vxpose.xlu1.b32.cont [10/16] %v278_v38, 128  ;;  %v381_v40 = vpop.trf.xlu1  ;;  %460 = vxpose.xlu0.b32.cont [10/16] %v277_v39, 128  ;;  %v349_v41 = vpop.trf.xlu0  ;;  %v310_v38 = vld [vmem:[%s1311_s24 + $0x398] sm:$0xff]  ;;  %v309_v39 = vld [vmem:[%s1311_s24 + $0x390] sm:$0xff] }
  0xcf   : > { %631 = vst [vmem:[%s1382_s15 + $0x1a0] sm:$0xff] %v381_v40  ;;  %599 = vst [vmem:[%s1382_s15 + $0xa0] sm:$0xff] %v349_v41 }
  0xd2   : > { %493 = vxpose.xlu1.b32.cont [11/16] %v280_v42, 128  ;;  %v382_v44 = vpop.trf.xlu1  ;;  %461 = vxpose.xlu0.b32.cont [11/16] %v279_v43, 128  ;;  %v350_v45 = vpop.trf.xlu0  ;;  %v312_v42 = vld [vmem:[%s1311_s24 + $0x3a8] sm:$0xff]  ;;  %v311_v43 = vld [vmem:[%s1311_s24 + $0x3a0] sm:$0xff] }
  0xd3   : > { %633 = vst [vmem:[%s1382_s15 + $0x1b0] sm:$0xff] %v382_v44  ;;  %601 = vst [vmem:[%s1382_s15 + $0xb0] sm:$0xff] %v350_v45 }
  0xd6   : > { %494 = vxpose.xlu1.b32.cont [12/16] %v282_v46, 128  ;;  %v383_v48 = vpop.trf.xlu1  ;;  %462 = vxpose.xlu0.b32.cont [12/16] %v281_v47, 128  ;;  %v351_v49 = vpop.trf.xlu0  ;;  %v314_v46 = vld [vmem:[%s1311_s24 + $0x3b8] sm:$0xff]  ;;  %v313_v47 = vld [vmem:[%s1311_s24 + $0x3b0] sm:$0xff] }
  0xd7   : > { %635 = vst [vmem:[%s1382_s15 + $0x1c0] sm:$0xff] %v383_v48  ;;  %603 = vst [vmem:[%s1382_s15 + $0xc0] sm:$0xff] %v351_v49 }
  0xda   : > { %495 = vxpose.xlu1.b32.cont [13/16] %v284_v50, 128  ;;  %v384_v52 = vpop.trf.xlu1  ;;  %463 = vxpose.xlu0.b32.cont [13/16] %v283_v51, 128  ;;  %v352_v53 = vpop.trf.xlu0  ;;  %v316_v50 = vld [vmem:[%s1311_s24 + $0x3c8] sm:$0xff]  ;;  %v315_v51 = vld [vmem:[%s1311_s24 + $0x3c0] sm:$0xff] }
  0xdb   : > { %637 = vst [vmem:[%s1382_s15 + $0x1d0] sm:$0xff] %v384_v52  ;;  %605 = vst [vmem:[%s1382_s15 + $0xd0] sm:$0xff] %v352_v53 }
  0xde   : > { %496 = vxpose.xlu1.b32.cont [14/16] %v286_v54, 128  ;;  %v385_v56 = vpop.trf.xlu1  ;;  %464 = vxpose.xlu0.b32.cont [14/16] %v285_v55, 128  ;;  %v353_v57 = vpop.trf.xlu0  ;;  %v318_v54 = vld [vmem:[%s1311_s24 + $0x3d8] sm:$0xff]  ;;  %v317_v55 = vld [vmem:[%s1311_s24 + $0x3d0] sm:$0xff] }
  0xdf   : > { %639 = vst [vmem:[%s1382_s15 + $0x1e0] sm:$0xff] %v385_v56  ;;  %607 = vst [vmem:[%s1382_s15 + $0xe0] sm:$0xff] %v353_v57 }
  0xe2   : > { %497 = vxpose.xlu1.b32.cont [15/16] %v288_v58, 128  ;;  %v386_v60 = vpop.trf.xlu1  ;;  %465 = vxpose.xlu0.b32.cont [15/16] %v287_v59, 128  ;;  %v354_v61 = vpop.trf.xlu0  ;;  %v320_v58 = vld [vmem:[%s1311_s24 + $0x3e8] sm:$0xff]  ;;  %v319_v59 = vld [vmem:[%s1311_s24 + $0x3e0] sm:$0xff] }
  0xe3   : > { %641 = vst [vmem:[%s1382_s15 + $0x1f0] sm:$0xff] %v386_v60  ;;  %609 = vst [vmem:[%s1382_s15 + $0xf0] sm:$0xff] %v354_v61 }
  0xe6   : > { %498 = vxpose.xlu1.b32.end [16/16] %v290_v62, 128  ;;  %v435_v0 = vpop.trf.xlu1  ;;  %466 = vxpose.xlu0.b32.end [16/16] %v289_v63, 128  ;;  %v403_v1 = vpop.trf.xlu0  ;;  %v322_v62 = vld [vmem:[%s1311_s24 + $0x3f8] sm:$0xff]  ;;  %v321_v63 = vld [vmem:[%s1311_s24 + $0x3f0] sm:$0xff] }
  0xe7   : > { %612 = vst [vmem:[%s1382_s15 + $0x108] sm:$0xff] %v435_v0  ;;  %580 = vst [vmem:[%s1382_s15 + $0x8] sm:$0xff] %v403_v1 }
  0xea   : > { %547 = vxpose.xlu1.b32.start [1/16] %v292_v2, 128  ;;  %v436_v4 = vpop.trf.xlu1  ;;  %515 = vxpose.xlu0.b32.start [1/16] %v291_v3, 128  ;;  %v404_v5 = vpop.trf.xlu0 }
  0xeb   : > { %614 = vst [vmem:[%s1382_s15 + $0x118] sm:$0xff] %v436_v4  ;;  %582 = vst [vmem:[%s1382_s15 + $0x18] sm:$0xff] %v404_v5 }
  0xee   : > { %548 = vxpose.xlu1.b32.cont [2/16] %v294_v6, 128  ;;  %v437_v8 = vpop.trf.xlu1  ;;  %516 = vxpose.xlu0.b32.cont [2/16] %v293_v7, 128  ;;  %v405_v9 = vpop.trf.xlu0 }
  0xef   : > { %616 = vst [vmem:[%s1382_s15 + $0x128] sm:$0xff] %v437_v8  ;;  %584 = vst [vmem:[%s1382_s15 + $0x28] sm:$0xff] %v405_v9 }
  0xf2   : > { %549 = vxpose.xlu1.b32.cont [3/16] %v296_v10, 128  ;;  %v438_v12 = vpop.trf.xlu1  ;;  %517 = vxpose.xlu0.b32.cont [3/16] %v295_v11, 128  ;;  %v406_v13 = vpop.trf.xlu0 }
  0xf3   : > { %618 = vst [vmem:[%s1382_s15 + $0x138] sm:$0xff] %v438_v12  ;;  %586 = vst [vmem:[%s1382_s15 + $0x38] sm:$0xff] %v406_v13 }
  0xf6   : > { %550 = vxpose.xlu1.b32.cont [4/16] %v298_v14, 128  ;;  %v439_v16 = vpop.trf.xlu1  ;;  %518 = vxpose.xlu0.b32.cont [4/16] %v297_v15, 128  ;;  %v407_v17 = vpop.trf.xlu0 }
  0xf7   : > { %620 = vst [vmem:[%s1382_s15 + $0x148] sm:$0xff] %v439_v16  ;;  %588 = vst [vmem:[%s1382_s15 + $0x48] sm:$0xff] %v407_v17 }
  0xfa   : > { %551 = vxpose.xlu1.b32.cont [5/16] %v300_v18, 128  ;;  %v440_v20 = vpop.trf.xlu1  ;;  %519 = vxpose.xlu0.b32.cont [5/16] %v299_v19, 128  ;;  %v408_v21 = vpop.trf.xlu0 }
  0xfb   : > { %622 = vst [vmem:[%s1382_s15 + $0x158] sm:$0xff] %v440_v20  ;;  %590 = vst [vmem:[%s1382_s15 + $0x58] sm:$0xff] %v408_v21 }
  0xfe   : > { %552 = vxpose.xlu1.b32.cont [6/16] %v302_v22, 128  ;;  %v441_v24 = vpop.trf.xlu1  ;;  %520 = vxpose.xlu0.b32.cont [6/16] %v301_v23, 128  ;;  %v409_v25 = vpop.trf.xlu0 }
  0xff   : > { %624 = vst [vmem:[%s1382_s15 + $0x168] sm:$0xff] %v441_v24  ;;  %592 = vst [vmem:[%s1382_s15 + $0x68] sm:$0xff] %v409_v25 }
 0x102   : > { %553 = vxpose.xlu1.b32.cont [7/16] %v304_v26, 128  ;;  %v442_v28 = vpop.trf.xlu1  ;;  %521 = vxpose.xlu0.b32.cont [7/16] %v303_v27, 128  ;;  %v410_v29 = vpop.trf.xlu0 }
 0x103   : > { %626 = vst [vmem:[%s1382_s15 + $0x178] sm:$0xff] %v442_v28  ;;  %594 = vst [vmem:[%s1382_s15 + $0x78] sm:$0xff] %v410_v29 }
 0x106   : > { %554 = vxpose.xlu1.b32.cont [8/16] %v306_v30, 128  ;;  %v443_v32 = vpop.trf.xlu1  ;;  %522 = vxpose.xlu0.b32.cont [8/16] %v305_v31, 128  ;;  %v411_v33 = vpop.trf.xlu0 }
 0x107   : > { %628 = vst [vmem:[%s1382_s15 + $0x188] sm:$0xff] %v443_v32  ;;  %596 = vst [vmem:[%s1382_s15 + $0x88] sm:$0xff] %v411_v33 }
 0x10a   : > { %555 = vxpose.xlu1.b32.cont [9/16] %v308_v34, 128  ;;  %v444_v36 = vpop.trf.xlu1  ;;  %523 = vxpose.xlu0.b32.cont [9/16] %v307_v35, 128  ;;  %v412_v37 = vpop.trf.xlu0 }
 0x10b   : > { %630 = vst [vmem:[%s1382_s15 + $0x198] sm:$0xff] %v444_v36  ;;  %598 = vst [vmem:[%s1382_s15 + $0x98] sm:$0xff] %v412_v37 }
 0x10e   : > { %556 = vxpose.xlu1.b32.cont [10/16] %v310_v38, 128  ;;  %v445_v40 = vpop.trf.xlu1  ;;  %524 = vxpose.xlu0.b32.cont [10/16] %v309_v39, 128  ;;  %v413_v41 = vpop.trf.xlu0 }
 0x10f   : > { %632 = vst [vmem:[%s1382_s15 + $0x1a8] sm:$0xff] %v445_v40  ;;  %600 = vst [vmem:[%s1382_s15 + $0xa8] sm:$0xff] %v413_v41 }
 0x112   : > { %557 = vxpose.xlu1.b32.cont [11/16] %v312_v42, 128  ;;  %v446_v44 = vpop.trf.xlu1  ;;  %525 = vxpose.xlu0.b32.cont [11/16] %v311_v43, 128  ;;  %v414_v45 = vpop.trf.xlu0 }
 0x113   : > { %634 = vst [vmem:[%s1382_s15 + $0x1b8] sm:$0xff] %v446_v44  ;;  %602 = vst [vmem:[%s1382_s15 + $0xb8] sm:$0xff] %v414_v45 }
 0x116   : > { %558 = vxpose.xlu1.b32.cont [12/16] %v314_v46, 128  ;;  %v447_v48 = vpop.trf.xlu1  ;;  %526 = vxpose.xlu0.b32.cont [12/16] %v313_v47, 128  ;;  %v415_v49 = vpop.trf.xlu0 }
 0x117   : > { %636 = vst [vmem:[%s1382_s15 + $0x1c8] sm:$0xff] %v447_v48  ;;  %604 = vst [vmem:[%s1382_s15 + $0xc8] sm:$0xff] %v415_v49 }
 0x11a   : > { %559 = vxpose.xlu1.b32.cont [13/16] %v316_v50, 128  ;;  %v448_v52 = vpop.trf.xlu1  ;;  %527 = vxpose.xlu0.b32.cont [13/16] %v315_v51, 128  ;;  %v416_v53 = vpop.trf.xlu0 }
 0x11b   : > { %638 = vst [vmem:[%s1382_s15 + $0x1d8] sm:$0xff] %v448_v52  ;;  %606 = vst [vmem:[%s1382_s15 + $0xd8] sm:$0xff] %v416_v53 }
 0x11e   : > { %560 = vxpose.xlu1.b32.cont [14/16] %v318_v54, 128  ;;  %v449_v56 = vpop.trf.xlu1  ;;  %528 = vxpose.xlu0.b32.cont [14/16] %v317_v55, 128  ;;  %v417_v57 = vpop.trf.xlu0 }
 0x11f   : > { %640 = vst [vmem:[%s1382_s15 + $0x1e8] sm:$0xff] %v449_v56  ;;  %608 = vst [vmem:[%s1382_s15 + $0xe8] sm:$0xff] %v417_v57 }
 0x122   : > { %561 = vxpose.xlu1.b32.cont [15/16] %v320_v58, 128  ;;  %v450_v60 = vpop.trf.xlu1  ;;  %529 = vxpose.xlu0.b32.cont [15/16] %v319_v59, 128  ;;  %v418_v61 = vpop.trf.xlu0 }
 0x123   : > { %642 = vst [vmem:[%s1382_s15 + $0x1f8] sm:$0xff] %v450_v60  ;;  %610 = vst [vmem:[%s1382_s15 + $0xf8] sm:$0xff] %v418_v61 }
 0x126   : > { %562 = vxpose.xlu1.b32.end [16/16] %v322_v62, 128  ;;  %v499_v0 = vpop.trf.xlu1  ;;  %530 = vxpose.xlu0.b32.end [16/16] %v321_v63, 128  ;;  %v467_v1 = vpop.trf.xlu0 }
 0x127   : > { %675 = vst [vmem:[%s1382_s15 + $0x300] sm:$0xff] %v499_v0  ;;  %643 = vst [vmem:[%s1382_s15 + $0x200] sm:$0xff] %v467_v1  ;;  %v735_v0 = vld [vmem:[%s1382_s15] sm:$0xff] (%p1279_p9)  ;;  %v737_v1 = vld [vmem:[%s1382_s15 + $0x8] sm:$0xff] (%p1279_p9) }
 0x128   : > { %736 = vst [vmem:[%s1585_s26] sm:$0xff] (%p1279_p9), %v735_v0  ;;  %738 = vst [vmem:[%s1585_s26 + $0x8] sm:$0xff] (%p1279_p9), %v737_v1 }
 0x12a   : > { %v500_v2 = vpop.trf.xlu1  ;;  %v468_v3 = vpop.trf.xlu0 }
 0x12b   : > { %677 = vst [vmem:[%s1382_s15 + $0x310] sm:$0xff] %v500_v2  ;;  %645 = vst [vmem:[%s1382_s15 + $0x210] sm:$0xff] %v468_v3  ;;  %v739_v2 = vld [vmem:[%s1382_s15 + $0x10] sm:$0xff] (%p1279_p9)  ;;  %v741_v3 = vld [vmem:[%s1382_s15 + $0x18] sm:$0xff] (%p1279_p9) }
 0x12c   : > { %740 = vst [vmem:[%s1585_s26 + $0x20] sm:$0xff] (%p1279_p9), %v739_v2  ;;  %742 = vst [vmem:[%s1585_s26 + $0x28] sm:$0xff] (%p1279_p9), %v741_v3 }
 0x12e   : > { %v501_v4 = vpop.trf.xlu1  ;;  %v469_v5 = vpop.trf.xlu0  ;;  %v863_v0 = vld [vmem:[%s1382_s15 + $0x200] sm:$0xff] (%p1279_p9) }
 0x12f   : > { %679 = vst [vmem:[%s1382_s15 + $0x320] sm:$0xff] %v501_v4  ;;  %647 = vst [vmem:[%s1382_s15 + $0x220] sm:$0xff] %v469_v5  ;;  %v743_v4 = vld [vmem:[%s1382_s15 + $0x20] sm:$0xff] (%p1279_p9)  ;;  %v745_v5 = vld [vmem:[%s1382_s15 + $0x28] sm:$0xff] (%p1279_p9) }
 0x130   : > { %744 = vst [vmem:[%s1585_s26 + $0x40] sm:$0xff] (%p1279_p9), %v743_v4  ;;  %746 = vst [vmem:[%s1585_s26 + $0x48] sm:$0xff] (%p1279_p9), %v745_v5 }
 0x131   : > { %864 = vst [vmem:[%s1585_s26 + $0x400] sm:$0xff] (%p1279_p9), %v863_v0 }
 0x132   : > { %v502_v6 = vpop.trf.xlu1  ;;  %v470_v7 = vpop.trf.xlu0  ;;  %v867_v2 = vld [vmem:[%s1382_s15 + $0x210] sm:$0xff] (%p1279_p9) }
 0x133   : > { %681 = vst [vmem:[%s1382_s15 + $0x330] sm:$0xff] %v502_v6  ;;  %649 = vst [vmem:[%s1382_s15 + $0x230] sm:$0xff] %v470_v7  ;;  %v747_v6 = vld [vmem:[%s1382_s15 + $0x30] sm:$0xff] (%p1279_p9)  ;;  %v749_v7 = vld [vmem:[%s1382_s15 + $0x38] sm:$0xff] (%p1279_p9) }
 0x134   : > { %748 = vst [vmem:[%s1585_s26 + $0x60] sm:$0xff] (%p1279_p9), %v747_v6  ;;  %750 = vst [vmem:[%s1585_s26 + $0x68] sm:$0xff] (%p1279_p9), %v749_v7 }
 0x135   : > { %868 = vst [vmem:[%s1585_s26 + $0x420] sm:$0xff] (%p1279_p9), %v867_v2 }
 0x136   : > { %v503_v8 = vpop.trf.xlu1  ;;  %v471_v9 = vpop.trf.xlu0  ;;  %v871_v4 = vld [vmem:[%s1382_s15 + $0x220] sm:$0xff] (%p1279_p9) }
 0x137   : > { %683 = vst [vmem:[%s1382_s15 + $0x340] sm:$0xff] %v503_v8  ;;  %651 = vst [vmem:[%s1382_s15 + $0x240] sm:$0xff] %v471_v9  ;;  %v751_v8 = vld [vmem:[%s1382_s15 + $0x40] sm:$0xff] (%p1279_p9)  ;;  %v753_v9 = vld [vmem:[%s1382_s15 + $0x48] sm:$0xff] (%p1279_p9) }
 0x138   : > { %752 = vst [vmem:[%s1585_s26 + $0x80] sm:$0xff] (%p1279_p9), %v751_v8  ;;  %754 = vst [vmem:[%s1585_s26 + $0x88] sm:$0xff] (%p1279_p9), %v753_v9 }
 0x139   : > { %872 = vst [vmem:[%s1585_s26 + $0x440] sm:$0xff] (%p1279_p9), %v871_v4 }
 0x13a   : > { %v504_v10 = vpop.trf.xlu1  ;;  %v472_v11 = vpop.trf.xlu0  ;;  %v875_v6 = vld [vmem:[%s1382_s15 + $0x230] sm:$0xff] (%p1279_p9) }
 0x13b   : > { %685 = vst [vmem:[%s1382_s15 + $0x350] sm:$0xff] %v504_v10  ;;  %653 = vst [vmem:[%s1382_s15 + $0x250] sm:$0xff] %v472_v11  ;;  %v755_v10 = vld [vmem:[%s1382_s15 + $0x50] sm:$0xff] (%p1279_p9)  ;;  %v757_v11 = vld [vmem:[%s1382_s15 + $0x58] sm:$0xff] (%p1279_p9) }
 0x13c   : > { %756 = vst [vmem:[%s1585_s26 + $0xa0] sm:$0xff] (%p1279_p9), %v755_v10  ;;  %758 = vst [vmem:[%s1585_s26 + $0xa8] sm:$0xff] (%p1279_p9), %v757_v11 }
 0x13d   : > { %876 = vst [vmem:[%s1585_s26 + $0x460] sm:$0xff] (%p1279_p9), %v875_v6 }
 0x13e   : > { %v505_v12 = vpop.trf.xlu1  ;;  %v473_v13 = vpop.trf.xlu0  ;;  %v879_v8 = vld [vmem:[%s1382_s15 + $0x240] sm:$0xff] (%p1279_p9) }
 0x13f   : > { %687 = vst [vmem:[%s1382_s15 + $0x360] sm:$0xff] %v505_v12  ;;  %655 = vst [vmem:[%s1382_s15 + $0x260] sm:$0xff] %v473_v13  ;;  %v759_v12 = vld [vmem:[%s1382_s15 + $0x60] sm:$0xff] (%p1279_p9)  ;;  %v761_v13 = vld [vmem:[%s1382_s15 + $0x68] sm:$0xff] (%p1279_p9) }
 0x140   : > { %760 = vst [vmem:[%s1585_s26 + $0xc0] sm:$0xff] (%p1279_p9), %v759_v12  ;;  %762 = vst [vmem:[%s1585_s26 + $0xc8] sm:$0xff] (%p1279_p9), %v761_v13 }
 0x141   : > { %880 = vst [vmem:[%s1585_s26 + $0x480] sm:$0xff] (%p1279_p9), %v879_v8 }
 0x142   : > { %v506_v14 = vpop.trf.xlu1  ;;  %v474_v15 = vpop.trf.xlu0  ;;  %v883_v10 = vld [vmem:[%s1382_s15 + $0x250] sm:$0xff] (%p1279_p9) }
 0x143   : > { %689 = vst [vmem:[%s1382_s15 + $0x370] sm:$0xff] %v506_v14  ;;  %657 = vst [vmem:[%s1382_s15 + $0x270] sm:$0xff] %v474_v15  ;;  %v763_v14 = vld [vmem:[%s1382_s15 + $0x70] sm:$0xff] (%p1279_p9)  ;;  %v765_v15 = vld [vmem:[%s1382_s15 + $0x78] sm:$0xff] (%p1279_p9) }
 0x144   : > { %764 = vst [vmem:[%s1585_s26 + $0xe0] sm:$0xff] (%p1279_p9), %v763_v14  ;;  %766 = vst [vmem:[%s1585_s26 + $0xe8] sm:$0xff] (%p1279_p9), %v765_v15 }
 0x145   : > { %884 = vst [vmem:[%s1585_s26 + $0x4a0] sm:$0xff] (%p1279_p9), %v883_v10 }
 0x146   : > { %v507_v16 = vpop.trf.xlu1  ;;  %v475_v17 = vpop.trf.xlu0  ;;  %v887_v12 = vld [vmem:[%s1382_s15 + $0x260] sm:$0xff] (%p1279_p9) }
 0x147   : > { %691 = vst [vmem:[%s1382_s15 + $0x380] sm:$0xff] %v507_v16  ;;  %659 = vst [vmem:[%s1382_s15 + $0x280] sm:$0xff] %v475_v17  ;;  %v767_v16 = vld [vmem:[%s1382_s15 + $0x80] sm:$0xff] (%p1279_p9)  ;;  %v769_v17 = vld [vmem:[%s1382_s15 + $0x88] sm:$0xff] (%p1279_p9) }
 0x148   : > { %768 = vst [vmem:[%s1585_s26 + $0x100] sm:$0xff] (%p1279_p9), %v767_v16  ;;  %770 = vst [vmem:[%s1585_s26 + $0x108] sm:$0xff] (%p1279_p9), %v769_v17 }
 0x149   : > { %888 = vst [vmem:[%s1585_s26 + $0x4c0] sm:$0xff] (%p1279_p9), %v887_v12 }
 0x14a   : > { %v508_v18 = vpop.trf.xlu1  ;;  %v476_v19 = vpop.trf.xlu0  ;;  %v891_v14 = vld [vmem:[%s1382_s15 + $0x270] sm:$0xff] (%p1279_p9) }
 0x14b   : > { %693 = vst [vmem:[%s1382_s15 + $0x390] sm:$0xff] %v508_v18  ;;  %661 = vst [vmem:[%s1382_s15 + $0x290] sm:$0xff] %v476_v19  ;;  %v771_v18 = vld [vmem:[%s1382_s15 + $0x90] sm:$0xff] (%p1279_p9)  ;;  %v773_v19 = vld [vmem:[%s1382_s15 + $0x98] sm:$0xff] (%p1279_p9) }
 0x14c   : > { %772 = vst [vmem:[%s1585_s26 + $0x120] sm:$0xff] (%p1279_p9), %v771_v18  ;;  %774 = vst [vmem:[%s1585_s26 + $0x128] sm:$0xff] (%p1279_p9), %v773_v19 }
 0x14d   : > { %892 = vst [vmem:[%s1585_s26 + $0x4e0] sm:$0xff] (%p1279_p9), %v891_v14 }
 0x14e   : > { %v509_v20 = vpop.trf.xlu1  ;;  %v477_v21 = vpop.trf.xlu0  ;;  %v895_v16 = vld [vmem:[%s1382_s15 + $0x280] sm:$0xff] (%p1279_p9) }
 0x14f   : > { %695 = vst [vmem:[%s1382_s15 + $0x3a0] sm:$0xff] %v509_v20  ;;  %663 = vst [vmem:[%s1382_s15 + $0x2a0] sm:$0xff] %v477_v21  ;;  %v775_v20 = vld [vmem:[%s1382_s15 + $0xa0] sm:$0xff] (%p1279_p9)  ;;  %v777_v21 = vld [vmem:[%s1382_s15 + $0xa8] sm:$0xff] (%p1279_p9) }
 0x150   : > { %776 = vst [vmem:[%s1585_s26 + $0x140] sm:$0xff] (%p1279_p9), %v775_v20  ;;  %778 = vst [vmem:[%s1585_s26 + $0x148] sm:$0xff] (%p1279_p9), %v777_v21 }
 0x151   : > { %896 = vst [vmem:[%s1585_s26 + $0x500] sm:$0xff] (%p1279_p9), %v895_v16 }
 0x152   : > { %v510_v22 = vpop.trf.xlu1  ;;  %v478_v23 = vpop.trf.xlu0  ;;  %v899_v18 = vld [vmem:[%s1382_s15 + $0x290] sm:$0xff] (%p1279_p9) }
 0x153   : > { %697 = vst [vmem:[%s1382_s15 + $0x3b0] sm:$0xff] %v510_v22  ;;  %665 = vst [vmem:[%s1382_s15 + $0x2b0] sm:$0xff] %v478_v23  ;;  %v779_v22 = vld [vmem:[%s1382_s15 + $0xb0] sm:$0xff] (%p1279_p9)  ;;  %v781_v23 = vld [vmem:[%s1382_s15 + $0xb8] sm:$0xff] (%p1279_p9) }
 0x154   : > { %780 = vst [vmem:[%s1585_s26 + $0x160] sm:$0xff] (%p1279_p9), %v779_v22  ;;  %782 = vst [vmem:[%s1585_s26 + $0x168] sm:$0xff] (%p1279_p9), %v781_v23 }
 0x155   : > { %900 = vst [vmem:[%s1585_s26 + $0x520] sm:$0xff] (%p1279_p9), %v899_v18 }
 0x156   : > { %v511_v24 = vpop.trf.xlu1  ;;  %v479_v25 = vpop.trf.xlu0  ;;  %v903_v20 = vld [vmem:[%s1382_s15 + $0x2a0] sm:$0xff] (%p1279_p9) }
 0x157   : > { %699 = vst [vmem:[%s1382_s15 + $0x3c0] sm:$0xff] %v511_v24  ;;  %667 = vst [vmem:[%s1382_s15 + $0x2c0] sm:$0xff] %v479_v25  ;;  %v783_v24 = vld [vmem:[%s1382_s15 + $0xc0] sm:$0xff] (%p1279_p9)  ;;  %v785_v25 = vld [vmem:[%s1382_s15 + $0xc8] sm:$0xff] (%p1279_p9) }
 0x158   : > { %784 = vst [vmem:[%s1585_s26 + $0x180] sm:$0xff] (%p1279_p9), %v783_v24  ;;  %786 = vst [vmem:[%s1585_s26 + $0x188] sm:$0xff] (%p1279_p9), %v785_v25 }
 0x159   : > { %904 = vst [vmem:[%s1585_s26 + $0x540] sm:$0xff] (%p1279_p9), %v903_v20 }
 0x15a   : > { %v512_v26 = vpop.trf.xlu1  ;;  %v480_v27 = vpop.trf.xlu0  ;;  %v907_v22 = vld [vmem:[%s1382_s15 + $0x2b0] sm:$0xff] (%p1279_p9) }
 0x15b   : > { %701 = vst [vmem:[%s1382_s15 + $0x3d0] sm:$0xff] %v512_v26  ;;  %669 = vst [vmem:[%s1382_s15 + $0x2d0] sm:$0xff] %v480_v27  ;;  %v787_v26 = vld [vmem:[%s1382_s15 + $0xd0] sm:$0xff] (%p1279_p9)  ;;  %v789_v27 = vld [vmem:[%s1382_s15 + $0xd8] sm:$0xff] (%p1279_p9) }
 0x15c   : > { %788 = vst [vmem:[%s1585_s26 + $0x1a0] sm:$0xff] (%p1279_p9), %v787_v26  ;;  %790 = vst [vmem:[%s1585_s26 + $0x1a8] sm:$0xff] (%p1279_p9), %v789_v27 }
 0x15d   : > { %908 = vst [vmem:[%s1585_s26 + $0x560] sm:$0xff] (%p1279_p9), %v907_v22 }
 0x15e   : > { %v513_v28 = vpop.trf.xlu1  ;;  %v481_v29 = vpop.trf.xlu0  ;;  %v911_v24 = vld [vmem:[%s1382_s15 + $0x2c0] sm:$0xff] (%p1279_p9) }
 0x15f   : > { %703 = vst [vmem:[%s1382_s15 + $0x3e0] sm:$0xff] %v513_v28  ;;  %671 = vst [vmem:[%s1382_s15 + $0x2e0] sm:$0xff] %v481_v29  ;;  %v791_v28 = vld [vmem:[%s1382_s15 + $0xe0] sm:$0xff] (%p1279_p9)  ;;  %v793_v29 = vld [vmem:[%s1382_s15 + $0xe8] sm:$0xff] (%p1279_p9) }
 0x160   : > { %792 = vst [vmem:[%s1585_s26 + $0x1c0] sm:$0xff] (%p1279_p9), %v791_v28  ;;  %794 = vst [vmem:[%s1585_s26 + $0x1c8] sm:$0xff] (%p1279_p9), %v793_v29 }
 0x161   : > { %912 = vst [vmem:[%s1585_s26 + $0x580] sm:$0xff] (%p1279_p9), %v911_v24 }
 0x162   : > { %v514_v30 = vpop.trf.xlu1  ;;  %v482_v31 = vpop.trf.xlu0  ;;  %v915_v26 = vld [vmem:[%s1382_s15 + $0x2d0] sm:$0xff] (%p1279_p9) }
 0x163   : > { %705 = vst [vmem:[%s1382_s15 + $0x3f0] sm:$0xff] %v514_v30  ;;  %673 = vst [vmem:[%s1382_s15 + $0x2f0] sm:$0xff] %v482_v31  ;;  %v795_v30 = vld [vmem:[%s1382_s15 + $0xf0] sm:$0xff] (%p1279_p9)  ;;  %v797_v31 = vld [vmem:[%s1382_s15 + $0xf8] sm:$0xff] (%p1279_p9) }
 0x164   : > { %796 = vst [vmem:[%s1585_s26 + $0x1e0] sm:$0xff] (%p1279_p9), %v795_v30  ;;  %798 = vst [vmem:[%s1585_s26 + $0x1e8] sm:$0xff] (%p1279_p9), %v797_v31 }
 0x165   : > { %916 = vst [vmem:[%s1585_s26 + $0x5a0] sm:$0xff] (%p1279_p9), %v915_v26 }
 0x166   : > { %v563_v32 = vpop.trf.xlu1  ;;  %v531_v33 = vpop.trf.xlu0  ;;  %v919_v28 = vld [vmem:[%s1382_s15 + $0x2e0] sm:$0xff] (%p1279_p9) }
 0x167   : > { %676 = vst [vmem:[%s1382_s15 + $0x308] sm:$0xff] %v563_v32  ;;  %644 = vst [vmem:[%s1382_s15 + $0x208] sm:$0xff] %v531_v33  ;;  %v799_v32 = vld [vmem:[%s1382_s15 + $0x100] sm:$0xff] (%p1279_p9)  ;;  %v801_v33 = vld [vmem:[%s1382_s15 + $0x108] sm:$0xff] (%p1279_p9) }
 0x168   : > { %800 = vst [vmem:[%s1585_s26 + $0x200] sm:$0xff] (%p1279_p9), %v799_v32  ;;  %802 = vst [vmem:[%s1585_s26 + $0x208] sm:$0xff] (%p1279_p9), %v801_v33  ;;  %v927_v32 = vld [vmem:[%s1382_s15 + $0x300] sm:$0xff] (%p1279_p9) }
 0x169   : > { %920 = vst [vmem:[%s1585_s26 + $0x5c0] sm:$0xff] (%p1279_p9), %v919_v28  ;;  %928 = vst [vmem:[%s1585_s26 + $0x600] sm:$0xff] (%p1279_p9), %v927_v32 }
 0x16a   : > { %v564_v34 = vpop.trf.xlu1  ;;  %v532_v35 = vpop.trf.xlu0  ;;  %v923_v30 = vld [vmem:[%s1382_s15 + $0x2f0] sm:$0xff] (%p1279_p9) }
 0x16b   : > { %678 = vst [vmem:[%s1382_s15 + $0x318] sm:$0xff] %v564_v34  ;;  %646 = vst [vmem:[%s1382_s15 + $0x218] sm:$0xff] %v532_v35  ;;  %v803_v34 = vld [vmem:[%s1382_s15 + $0x110] sm:$0xff] (%p1279_p9)  ;;  %v805_v35 = vld [vmem:[%s1382_s15 + $0x118] sm:$0xff] (%p1279_p9) }
 0x16c   : > { %804 = vst [vmem:[%s1585_s26 + $0x220] sm:$0xff] (%p1279_p9), %v803_v34  ;;  %806 = vst [vmem:[%s1585_s26 + $0x228] sm:$0xff] (%p1279_p9), %v805_v35  ;;  %v931_v34 = vld [vmem:[%s1382_s15 + $0x310] sm:$0xff] (%p1279_p9) }
 0x16d   : > { %924 = vst [vmem:[%s1585_s26 + $0x5e0] sm:$0xff] (%p1279_p9), %v923_v30  ;;  %932 = vst [vmem:[%s1585_s26 + $0x620] sm:$0xff] (%p1279_p9), %v931_v34 }
 0x16e   : > { %v565_v36 = vpop.trf.xlu1  ;;  %v533_v37 = vpop.trf.xlu0  ;;  %v865_v1 = vld [vmem:[%s1382_s15 + $0x208] sm:$0xff] (%p1279_p9) }
 0x16f   : > { %680 = vst [vmem:[%s1382_s15 + $0x328] sm:$0xff] %v565_v36  ;;  %648 = vst [vmem:[%s1382_s15 + $0x228] sm:$0xff] %v533_v37  ;;  %v807_v36 = vld [vmem:[%s1382_s15 + $0x120] sm:$0xff] (%p1279_p9)  ;;  %v809_v37 = vld [vmem:[%s1382_s15 + $0x128] sm:$0xff] (%p1279_p9) }
 0x170   : > { %808 = vst [vmem:[%s1585_s26 + $0x240] sm:$0xff] (%p1279_p9), %v807_v36  ;;  %810 = vst [vmem:[%s1585_s26 + $0x248] sm:$0xff] (%p1279_p9), %v809_v37  ;;  %v929_v33 = vld [vmem:[%s1382_s15 + $0x308] sm:$0xff] (%p1279_p9)  ;;  %v935_v36 = vld [vmem:[%s1382_s15 + $0x320] sm:$0xff] (%p1279_p9) }
 0x171   : > { %866 = vst [vmem:[%s1585_s26 + $0x408] sm:$0xff] (%p1279_p9), %v865_v1  ;;  %930 = vst [vmem:[%s1585_s26 + $0x608] sm:$0xff] (%p1279_p9), %v929_v33 }
 0x172   : > { %v566_v38 = vpop.trf.xlu1  ;;  %v534_v39 = vpop.trf.xlu0  ;;  %v869_v3 = vld [vmem:[%s1382_s15 + $0x218] sm:$0xff] (%p1279_p9)  ;;  %936 = vst [vmem:[%s1585_s26 + $0x640] sm:$0xff] (%p1279_p9), %v935_v36 }
 0x173   : > { %682 = vst [vmem:[%s1382_s15 + $0x338] sm:$0xff] %v566_v38  ;;  %650 = vst [vmem:[%s1382_s15 + $0x238] sm:$0xff] %v534_v39  ;;  %v811_v38 = vld [vmem:[%s1382_s15 + $0x130] sm:$0xff] (%p1279_p9)  ;;  %v813_v39 = vld [vmem:[%s1382_s15 + $0x138] sm:$0xff] (%p1279_p9) }
 0x174   : > { %812 = vst [vmem:[%s1585_s26 + $0x260] sm:$0xff] (%p1279_p9), %v811_v38  ;;  %814 = vst [vmem:[%s1585_s26 + $0x268] sm:$0xff] (%p1279_p9), %v813_v39  ;;  %v933_v35 = vld [vmem:[%s1382_s15 + $0x318] sm:$0xff] (%p1279_p9)  ;;  %v939_v38 = vld [vmem:[%s1382_s15 + $0x330] sm:$0xff] (%p1279_p9) }
 0x175   : > { %870 = vst [vmem:[%s1585_s26 + $0x428] sm:$0xff] (%p1279_p9), %v869_v3  ;;  %934 = vst [vmem:[%s1585_s26 + $0x628] sm:$0xff] (%p1279_p9), %v933_v35 }
 0x176   : > { %v567_v40 = vpop.trf.xlu1  ;;  %v535_v41 = vpop.trf.xlu0  ;;  %v873_v5 = vld [vmem:[%s1382_s15 + $0x228] sm:$0xff] (%p1279_p9)  ;;  %940 = vst [vmem:[%s1585_s26 + $0x660] sm:$0xff] (%p1279_p9), %v939_v38 }
 0x177   : > { %684 = vst [vmem:[%s1382_s15 + $0x348] sm:$0xff] %v567_v40  ;;  %652 = vst [vmem:[%s1382_s15 + $0x248] sm:$0xff] %v535_v41  ;;  %v815_v40 = vld [vmem:[%s1382_s15 + $0x140] sm:$0xff] (%p1279_p9)  ;;  %v817_v41 = vld [vmem:[%s1382_s15 + $0x148] sm:$0xff] (%p1279_p9) }
 0x178   : > { %816 = vst [vmem:[%s1585_s26 + $0x280] sm:$0xff] (%p1279_p9), %v815_v40  ;;  %818 = vst [vmem:[%s1585_s26 + $0x288] sm:$0xff] (%p1279_p9), %v817_v41  ;;  %v937_v37 = vld [vmem:[%s1382_s15 + $0x328] sm:$0xff] (%p1279_p9)  ;;  %v943_v40 = vld [vmem:[%s1382_s15 + $0x340] sm:$0xff] (%p1279_p9) }
 0x179   : > { %874 = vst [vmem:[%s1585_s26 + $0x448] sm:$0xff] (%p1279_p9), %v873_v5  ;;  %938 = vst [vmem:[%s1585_s26 + $0x648] sm:$0xff] (%p1279_p9), %v937_v37 }
 0x17a   : > { %v568_v42 = vpop.trf.xlu1  ;;  %v536_v43 = vpop.trf.xlu0  ;;  %v877_v7 = vld [vmem:[%s1382_s15 + $0x238] sm:$0xff] (%p1279_p9)  ;;  %944 = vst [vmem:[%s1585_s26 + $0x680] sm:$0xff] (%p1279_p9), %v943_v40 }
 0x17b   : > { %686 = vst [vmem:[%s1382_s15 + $0x358] sm:$0xff] %v568_v42  ;;  %654 = vst [vmem:[%s1382_s15 + $0x258] sm:$0xff] %v536_v43  ;;  %v819_v42 = vld [vmem:[%s1382_s15 + $0x150] sm:$0xff] (%p1279_p9)  ;;  %v821_v43 = vld [vmem:[%s1382_s15 + $0x158] sm:$0xff] (%p1279_p9) }
 0x17c   : > { %820 = vst [vmem:[%s1585_s26 + $0x2a0] sm:$0xff] (%p1279_p9), %v819_v42  ;;  %822 = vst [vmem:[%s1585_s26 + $0x2a8] sm:$0xff] (%p1279_p9), %v821_v43  ;;  %v941_v39 = vld [vmem:[%s1382_s15 + $0x338] sm:$0xff] (%p1279_p9)  ;;  %v947_v42 = vld [vmem:[%s1382_s15 + $0x350] sm:$0xff] (%p1279_p9) }
 0x17d   : > { %878 = vst [vmem:[%s1585_s26 + $0x468] sm:$0xff] (%p1279_p9), %v877_v7  ;;  %942 = vst [vmem:[%s1585_s26 + $0x668] sm:$0xff] (%p1279_p9), %v941_v39 }
 0x17e   : > { %v569_v44 = vpop.trf.xlu1  ;;  %v537_v45 = vpop.trf.xlu0  ;;  %v881_v9 = vld [vmem:[%s1382_s15 + $0x248] sm:$0xff] (%p1279_p9)  ;;  %948 = vst [vmem:[%s1585_s26 + $0x6a0] sm:$0xff] (%p1279_p9), %v947_v42 }
 0x17f   : > { %688 = vst [vmem:[%s1382_s15 + $0x368] sm:$0xff] %v569_v44  ;;  %656 = vst [vmem:[%s1382_s15 + $0x268] sm:$0xff] %v537_v45  ;;  %v823_v44 = vld [vmem:[%s1382_s15 + $0x160] sm:$0xff] (%p1279_p9)  ;;  %v825_v45 = vld [vmem:[%s1382_s15 + $0x168] sm:$0xff] (%p1279_p9) }
 0x180   : > { %824 = vst [vmem:[%s1585_s26 + $0x2c0] sm:$0xff] (%p1279_p9), %v823_v44  ;;  %826 = vst [vmem:[%s1585_s26 + $0x2c8] sm:$0xff] (%p1279_p9), %v825_v45  ;;  %v945_v41 = vld [vmem:[%s1382_s15 + $0x348] sm:$0xff] (%p1279_p9)  ;;  %v951_v44 = vld [vmem:[%s1382_s15 + $0x360] sm:$0xff] (%p1279_p9) }
 0x181   : > { %882 = vst [vmem:[%s1585_s26 + $0x488] sm:$0xff] (%p1279_p9), %v881_v9  ;;  %946 = vst [vmem:[%s1585_s26 + $0x688] sm:$0xff] (%p1279_p9), %v945_v41 }
 0x182   : > { %v570_v46 = vpop.trf.xlu1  ;;  %v538_v47 = vpop.trf.xlu0  ;;  %v885_v11 = vld [vmem:[%s1382_s15 + $0x258] sm:$0xff] (%p1279_p9)  ;;  %952 = vst [vmem:[%s1585_s26 + $0x6c0] sm:$0xff] (%p1279_p9), %v951_v44 }
 0x183   : > { %690 = vst [vmem:[%s1382_s15 + $0x378] sm:$0xff] %v570_v46  ;;  %658 = vst [vmem:[%s1382_s15 + $0x278] sm:$0xff] %v538_v47  ;;  %v827_v46 = vld [vmem:[%s1382_s15 + $0x170] sm:$0xff] (%p1279_p9)  ;;  %v829_v47 = vld [vmem:[%s1382_s15 + $0x178] sm:$0xff] (%p1279_p9) }
 0x184   : > { %828 = vst [vmem:[%s1585_s26 + $0x2e0] sm:$0xff] (%p1279_p9), %v827_v46  ;;  %830 = vst [vmem:[%s1585_s26 + $0x2e8] sm:$0xff] (%p1279_p9), %v829_v47  ;;  %v949_v43 = vld [vmem:[%s1382_s15 + $0x358] sm:$0xff] (%p1279_p9)  ;;  %v955_v46 = vld [vmem:[%s1382_s15 + $0x370] sm:$0xff] (%p1279_p9) }
 0x185   : > { %886 = vst [vmem:[%s1585_s26 + $0x4a8] sm:$0xff] (%p1279_p9), %v885_v11  ;;  %950 = vst [vmem:[%s1585_s26 + $0x6a8] sm:$0xff] (%p1279_p9), %v949_v43 }
 0x186   : > { %v571_v48 = vpop.trf.xlu1  ;;  %v539_v49 = vpop.trf.xlu0  ;;  %v889_v13 = vld [vmem:[%s1382_s15 + $0x268] sm:$0xff] (%p1279_p9)  ;;  %956 = vst [vmem:[%s1585_s26 + $0x6e0] sm:$0xff] (%p1279_p9), %v955_v46 }
 0x187   : > { %692 = vst [vmem:[%s1382_s15 + $0x388] sm:$0xff] %v571_v48  ;;  %660 = vst [vmem:[%s1382_s15 + $0x288] sm:$0xff] %v539_v49  ;;  %v831_v48 = vld [vmem:[%s1382_s15 + $0x180] sm:$0xff] (%p1279_p9)  ;;  %v833_v49 = vld [vmem:[%s1382_s15 + $0x188] sm:$0xff] (%p1279_p9) }
 0x188   : > { %832 = vst [vmem:[%s1585_s26 + $0x300] sm:$0xff] (%p1279_p9), %v831_v48  ;;  %834 = vst [vmem:[%s1585_s26 + $0x308] sm:$0xff] (%p1279_p9), %v833_v49  ;;  %v953_v45 = vld [vmem:[%s1382_s15 + $0x368] sm:$0xff] (%p1279_p9)  ;;  %v959_v48 = vld [vmem:[%s1382_s15 + $0x380] sm:$0xff] (%p1279_p9) }
 0x189   : > { %890 = vst [vmem:[%s1585_s26 + $0x4c8] sm:$0xff] (%p1279_p9), %v889_v13  ;;  %954 = vst [vmem:[%s1585_s26 + $0x6c8] sm:$0xff] (%p1279_p9), %v953_v45 }
 0x18a   : > { %v572_v50 = vpop.trf.xlu1  ;;  %v540_v51 = vpop.trf.xlu0  ;;  %v893_v15 = vld [vmem:[%s1382_s15 + $0x278] sm:$0xff] (%p1279_p9)  ;;  %960 = vst [vmem:[%s1585_s26 + $0x700] sm:$0xff] (%p1279_p9), %v959_v48 }
 0x18b   : > { %694 = vst [vmem:[%s1382_s15 + $0x398] sm:$0xff] %v572_v50  ;;  %662 = vst [vmem:[%s1382_s15 + $0x298] sm:$0xff] %v540_v51  ;;  %v835_v50 = vld [vmem:[%s1382_s15 + $0x190] sm:$0xff] (%p1279_p9)  ;;  %v837_v51 = vld [vmem:[%s1382_s15 + $0x198] sm:$0xff] (%p1279_p9) }
 0x18c   : > { %836 = vst [vmem:[%s1585_s26 + $0x320] sm:$0xff] (%p1279_p9), %v835_v50  ;;  %838 = vst [vmem:[%s1585_s26 + $0x328] sm:$0xff] (%p1279_p9), %v837_v51  ;;  %v957_v47 = vld [vmem:[%s1382_s15 + $0x378] sm:$0xff] (%p1279_p9)  ;;  %v963_v50 = vld [vmem:[%s1382_s15 + $0x390] sm:$0xff] (%p1279_p9) }
 0x18d   : > { %894 = vst [vmem:[%s1585_s26 + $0x4e8] sm:$0xff] (%p1279_p9), %v893_v15  ;;  %958 = vst [vmem:[%s1585_s26 + $0x6e8] sm:$0xff] (%p1279_p9), %v957_v47 }
 0x18e   : > { %v573_v52 = vpop.trf.xlu1  ;;  %v541_v53 = vpop.trf.xlu0  ;;  %v897_v17 = vld [vmem:[%s1382_s15 + $0x288] sm:$0xff] (%p1279_p9)  ;;  %964 = vst [vmem:[%s1585_s26 + $0x720] sm:$0xff] (%p1279_p9), %v963_v50 }
 0x18f   : > { %696 = vst [vmem:[%s1382_s15 + $0x3a8] sm:$0xff] %v573_v52  ;;  %664 = vst [vmem:[%s1382_s15 + $0x2a8] sm:$0xff] %v541_v53  ;;  %v839_v52 = vld [vmem:[%s1382_s15 + $0x1a0] sm:$0xff] (%p1279_p9)  ;;  %v841_v53 = vld [vmem:[%s1382_s15 + $0x1a8] sm:$0xff] (%p1279_p9) }
 0x190   : > { %840 = vst [vmem:[%s1585_s26 + $0x340] sm:$0xff] (%p1279_p9), %v839_v52  ;;  %842 = vst [vmem:[%s1585_s26 + $0x348] sm:$0xff] (%p1279_p9), %v841_v53  ;;  %v961_v49 = vld [vmem:[%s1382_s15 + $0x388] sm:$0xff] (%p1279_p9)  ;;  %v967_v52 = vld [vmem:[%s1382_s15 + $0x3a0] sm:$0xff] (%p1279_p9) }
 0x191   : > { %898 = vst [vmem:[%s1585_s26 + $0x508] sm:$0xff] (%p1279_p9), %v897_v17  ;;  %962 = vst [vmem:[%s1585_s26 + $0x708] sm:$0xff] (%p1279_p9), %v961_v49 }
 0x192   : > { %v574_v54 = vpop.trf.xlu1  ;;  %v542_v55 = vpop.trf.xlu0  ;;  %v901_v19 = vld [vmem:[%s1382_s15 + $0x298] sm:$0xff] (%p1279_p9)  ;;  %968 = vst [vmem:[%s1585_s26 + $0x740] sm:$0xff] (%p1279_p9), %v967_v52 }
 0x193   : > { %698 = vst [vmem:[%s1382_s15 + $0x3b8] sm:$0xff] %v574_v54  ;;  %666 = vst [vmem:[%s1382_s15 + $0x2b8] sm:$0xff] %v542_v55  ;;  %v843_v54 = vld [vmem:[%s1382_s15 + $0x1b0] sm:$0xff] (%p1279_p9)  ;;  %v845_v55 = vld [vmem:[%s1382_s15 + $0x1b8] sm:$0xff] (%p1279_p9) }
 0x194   : > { %844 = vst [vmem:[%s1585_s26 + $0x360] sm:$0xff] (%p1279_p9), %v843_v54  ;;  %846 = vst [vmem:[%s1585_s26 + $0x368] sm:$0xff] (%p1279_p9), %v845_v55  ;;  %v965_v51 = vld [vmem:[%s1382_s15 + $0x398] sm:$0xff] (%p1279_p9)  ;;  %v971_v54 = vld [vmem:[%s1382_s15 + $0x3b0] sm:$0xff] (%p1279_p9) }
 0x195   : > { %902 = vst [vmem:[%s1585_s26 + $0x528] sm:$0xff] (%p1279_p9), %v901_v19  ;;  %966 = vst [vmem:[%s1585_s26 + $0x728] sm:$0xff] (%p1279_p9), %v965_v51 }
 0x196   : > { %v575_v56 = vpop.trf.xlu1  ;;  %v543_v57 = vpop.trf.xlu0  ;;  %v905_v21 = vld [vmem:[%s1382_s15 + $0x2a8] sm:$0xff] (%p1279_p9)  ;;  %972 = vst [vmem:[%s1585_s26 + $0x760] sm:$0xff] (%p1279_p9), %v971_v54 }
 0x197   : > { %700 = vst [vmem:[%s1382_s15 + $0x3c8] sm:$0xff] %v575_v56  ;;  %668 = vst [vmem:[%s1382_s15 + $0x2c8] sm:$0xff] %v543_v57  ;;  %v847_v56 = vld [vmem:[%s1382_s15 + $0x1c0] sm:$0xff] (%p1279_p9)  ;;  %v849_v57 = vld [vmem:[%s1382_s15 + $0x1c8] sm:$0xff] (%p1279_p9) }
 0x198   : > { %848 = vst [vmem:[%s1585_s26 + $0x380] sm:$0xff] (%p1279_p9), %v847_v56  ;;  %850 = vst [vmem:[%s1585_s26 + $0x388] sm:$0xff] (%p1279_p9), %v849_v57  ;;  %v969_v53 = vld [vmem:[%s1382_s15 + $0x3a8] sm:$0xff] (%p1279_p9)  ;;  %v975_v56 = vld [vmem:[%s1382_s15 + $0x3c0] sm:$0xff] (%p1279_p9) }
 0x199   : > { %906 = vst [vmem:[%s1585_s26 + $0x548] sm:$0xff] (%p1279_p9), %v905_v21  ;;  %970 = vst [vmem:[%s1585_s26 + $0x748] sm:$0xff] (%p1279_p9), %v969_v53 }
 0x19a   : > { %v576_v58 = vpop.trf.xlu1  ;;  %v544_v59 = vpop.trf.xlu0  ;;  %v909_v23 = vld [vmem:[%s1382_s15 + $0x2b8] sm:$0xff] (%p1279_p9)  ;;  %976 = vst [vmem:[%s1585_s26 + $0x780] sm:$0xff] (%p1279_p9), %v975_v56 }
 0x19b   : > { %702 = vst [vmem:[%s1382_s15 + $0x3d8] sm:$0xff] %v576_v58  ;;  %670 = vst [vmem:[%s1382_s15 + $0x2d8] sm:$0xff] %v544_v59  ;;  %v851_v58 = vld [vmem:[%s1382_s15 + $0x1d0] sm:$0xff] (%p1279_p9)  ;;  %v853_v59 = vld [vmem:[%s1382_s15 + $0x1d8] sm:$0xff] (%p1279_p9) }
 0x19c   : > { %852 = vst [vmem:[%s1585_s26 + $0x3a0] sm:$0xff] (%p1279_p9), %v851_v58  ;;  %854 = vst [vmem:[%s1585_s26 + $0x3a8] sm:$0xff] (%p1279_p9), %v853_v59  ;;  %v973_v55 = vld [vmem:[%s1382_s15 + $0x3b8] sm:$0xff] (%p1279_p9)  ;;  %v979_v58 = vld [vmem:[%s1382_s15 + $0x3d0] sm:$0xff] (%p1279_p9) }
 0x19d   : > { %910 = vst [vmem:[%s1585_s26 + $0x568] sm:$0xff] (%p1279_p9), %v909_v23  ;;  %974 = vst [vmem:[%s1585_s26 + $0x768] sm:$0xff] (%p1279_p9), %v973_v55 }
 0x19e   : > { %v577_v60 = vpop.trf.xlu1  ;;  %v545_v61 = vpop.trf.xlu0  ;;  %v913_v25 = vld [vmem:[%s1382_s15 + $0x2c8] sm:$0xff] (%p1279_p9)  ;;  %980 = vst [vmem:[%s1585_s26 + $0x7a0] sm:$0xff] (%p1279_p9), %v979_v58 }
 0x19f   : > { %704 = vst [vmem:[%s1382_s15 + $0x3e8] sm:$0xff] %v577_v60  ;;  %672 = vst [vmem:[%s1382_s15 + $0x2e8] sm:$0xff] %v545_v61  ;;  %713 = sbr.rel (!%p1279_p9) target bundleno = 429 (0x1ad), region = 32  ;;  %v855_v60 = vld [vmem:[%s1382_s15 + $0x1e0] sm:$0xff] (%p1279_p9)  ;;  %v857_v61 = vld [vmem:[%s1382_s15 + $0x1e8] sm:$0xff] (%p1279_p9) }
 0x1a0   : > { %856 = vst [vmem:[%s1585_s26 + $0x3c0] sm:$0xff] (%p1279_p9), %v855_v60  ;;  %858 = vst [vmem:[%s1585_s26 + $0x3c8] sm:$0xff] (%p1279_p9), %v857_v61  ;;  %v977_v57 = vld [vmem:[%s1382_s15 + $0x3c8] sm:$0xff] (%p1279_p9)  ;;  %v983_v60 = vld [vmem:[%s1382_s15 + $0x3e0] sm:$0xff] (%p1279_p9) }
 0x1a1   : > { %914 = vst [vmem:[%s1585_s26 + $0x588] sm:$0xff] (%p1279_p9), %v913_v25  ;;  %978 = vst [vmem:[%s1585_s26 + $0x788] sm:$0xff] (%p1279_p9), %v977_v57 }
 0x1a2   : > { %v578_v62 = vpop.trf.xlu1  ;;  %v546_v63 = vpop.trf.xlu0  ;;  %v917_v27 = vld [vmem:[%s1382_s15 + $0x2d8] sm:$0xff] (%p1279_p9)  ;;  %984 = vst [vmem:[%s1585_s26 + $0x7c0] sm:$0xff] (%p1279_p9), %v983_v60 }
 0x1a3   : > { %706 = vst [vmem:[%s1382_s15 + $0x3f8] sm:$0xff] %v578_v62  ;;  %674 = vst [vmem:[%s1382_s15 + $0x2f8] sm:$0xff] %v546_v63  ;;  %v859_v62 = vld [vmem:[%s1382_s15 + $0x1f0] sm:$0xff] (%p1279_p9)  ;;  %v861_v63 = vld [vmem:[%s1382_s15 + $0x1f8] sm:$0xff] (%p1279_p9) }
 0x1a4   : > { %860 = vst [vmem:[%s1585_s26 + $0x3e0] sm:$0xff] %v859_v62  ;;  %862 = vst [vmem:[%s1585_s26 + $0x3e8] sm:$0xff] %v861_v63  ;;  %v981_v59 = vld [vmem:[%s1382_s15 + $0x3d8] sm:$0xff]  ;;  %v987_v62 = vld [vmem:[%s1382_s15 + $0x3f0] sm:$0xff] }
 0x1a5   : > { %918 = vst [vmem:[%s1585_s26 + $0x5a8] sm:$0xff] %v917_v27  ;;  %982 = vst [vmem:[%s1585_s26 + $0x7a8] sm:$0xff] %v981_v59 }
 0x1a6   : > { %v921_v29 = vld [vmem:[%s1382_s15 + $0x2e8] sm:$0xff]  ;;  %988 = vst [vmem:[%s1585_s26 + $0x7e0] sm:$0xff] %v987_v62 }
 0x1a7   : > { %922 = vst [vmem:[%s1585_s26 + $0x5c8] sm:$0xff] %v921_v29  ;;  %v985_v61 = vld [vmem:[%s1382_s15 + $0x3e8] sm:$0xff] }
 0x1a8   : > { %986 = vst [vmem:[%s1585_s26 + $0x7c8] sm:$0xff] %v985_v61 }
 0x1aa   : > { %v925_v31 = vld [vmem:[%s1382_s15 + $0x2f8] sm:$0xff] }
 0x1ab   : > { %926 = vst [vmem:[%s1585_s26 + $0x5e8] sm:$0xff] %v925_v31  ;;  %v989_v63 = vld [vmem:[%s1382_s15 + $0x3f8] sm:$0xff] }
 0x1ac   : > { %990 = vst [vmem:[%s1585_s26 + $0x7e8] sm:$0xff] %v989_v63 }
 0x1ad PF: > { %s14_s11 = sadd.s32 1, %s1211_s11   ;;  %s1863_s6 = smov %s1195_s7 }
 0x1ae   : > { %p11_p0 = scmp.ge.s32.totalorder %s14_s11, 4   ;;  %s1864_s7 = smov %s1199_s8 }
 0x1af   : > { %s1865_s8 = smov %s1277_s18  ;;  %s1866_s9 = smov %s1207_s10 }
 0x1b0   : > { %s1867_s10 = smov %s1869_s13  ;;  %13 = sbr.rel (!%p11_p0) target bundleno = 4 (0x4), region = 92 }
 0x1b5   :  { %1006 = vsyncpa [#allocation3], 1 }
 0x1b6   :  { %1008 = vsyncpa [#allocation3 + $0x1], 1 }

</bundles_post_ra>
